<compile_context>
chip_gen: v5e
topology: v5e:2x2
jax: 0.10.0
libtpu: 0.0.40
codegen_flags: <defaults>
</compile_context>

<pallas_src>
import functools
import numpy as np
import jax
import jax.numpy as jnp
from jax.experimental import pallas as pl
from jax.experimental.pallas import tpu as pltpu


def _round_up(v, m):
    return (v + m - 1) // m * m


# TODO(synk): the base-class `apply_net` activation comes from the ctor arg `activation: str`
# (source not shown); ReLU is the default here, sigmoid/tanh are selectable for parity.
_ACTIVATIONS = {
    "relu": lambda h: jnp.maximum(h, 0.0),
    "sigmoid": jax.nn.sigmoid,
    "tanh": jnp.tanh,
}


def _fused_mlp_kernel(tile_type_ref, x_ref, w1_ref, b1_ref, w2_ref, b2_ref, o_ref, *, act):
    # tile_type_ref (scalar prefetch) is only consumed by the index_maps.
    del tile_type_ref
    # hidden = activation(x @ W1 + b1): bf16 MXU matmul, f32 accumulation, f32 epilogue.
    h = jnp.dot(x_ref[...], w1_ref[...], preferred_element_type=jnp.float32)
    h = _ACTIVATIONS[act](h + b1_ref[0:1, :])
    # out = hidden @ W2 + b2   (W2/b2 columns already zero-padded to the `_pad` width)
    o = jnp.dot(h.astype(jnp.bfloat16), w2_ref[...], preferred_element_type=jnp.float32)
    o_ref[...] = o + b2_ref[0:1, :]


def prepare_params(params, input_size, hidden_size, output_sizes):
    """One-time parameter prep: pad, stack per node type, and cast weights to bf16.

    W1s: (T, IN_p, H_p) bf16, b1s: (T, 8, H_p) f32, W2s: (T, H_p, OUT_p) bf16, b2s: (T, 8, OUT_p) f32
    with IN_p = round_up(input_size, 8) (no 128 blow-up of the K dim), H_p = round_up(hidden, 128),
    OUT_p = round_up(max(output_sizes), 128).  Zero padding of W2/b2 columns reproduces the
    base-class `_pad` (zero-pad last dim to max(output_sizes)).
    """
    T = len(output_sizes)
    max_out = max(output_sizes)
    in_p = _round_up(input_size, 8)
    h_p = _round_up(hidden_size, 128)
    out_p = _round_up(max_out, 128)

    W1s = np.zeros((T, in_p, h_p), np.float32)
    b1s = np.zeros((T, 8, h_p), np.float32)
    W2s = np.zeros((T, h_p, out_p), np.float32)
    b2s = np.zeros((T, 8, out_p), np.float32)
    for t, (w1, b1, w2, b2) in enumerate(params):
        out_t = output_sizes[t]
        W1s[t, :input_size, :hidden_size] = np.asarray(w1, np.float32)
        b1s[t, 0, :hidden_size] = np.asarray(b1, np.float32)
        W2s[t, :hidden_size, :out_t] = np.asarray(w2, np.float32)
        b2s[t, 0, :out_t] = np.asarray(b2, np.float32)
    # bf16 weights feed the MXU natively on v5e/v6e/v7x and halve the weight HBM/VMEM traffic;
    # biases stay f32 (the epilogue is f32).
    return (jnp.asarray(W1s, jnp.bfloat16), jnp.asarray(b1s, jnp.float32),
            jnp.asarray(W2s, jnp.bfloat16), jnp.asarray(b2s, jnp.float32))


@functools.partial(jax.jit, static_argnums=(0, 1, 2))
def _forward_jit(activation, max_out, tm, W1s, b1s, W2s, b2s, tile_type_ids, *xs):
    """Whole numeric forward under one jit: one concat pass over x, one pallas_call, per-type slices."""
    in_size = int(xs[0].shape[1])
    in_p = int(W1s.shape[1])
    h_p = int(W1s.shape[2])
    out_p = int(W2s.shape[2])

    # Per-type row counts are already bucketed to multiples of tm outside (stable traced shapes).
    pad_ns, offsets, off = [], [], 0
    for x in xs:
        pad_ns.append(int(x.shape[0]))
        offsets.append(off)
        off += int(x.shape[0])
    total_rows = off
    num_tiles = total_rows // tm

    # Ragged/grouped x: a single fused concat/cast pass; no (T, n_max) max-padded stack.
    x_grouped = jnp.concatenate([x.astype(jnp.bfloat16) for x in xs], axis=0)
    if in_p != in_size:
        x_grouped = jnp.pad(x_grouped, ((0, 0), (0, in_p - in_size)))

    flops = 2 * total_rows * (in_p * h_p + h_p * out_p)
    transcendentals = total_rows * h_p if activation in ("sigmoid", "tanh") else 0
    bytes_accessed = int(x_grouped.size) * 2 + total_rows * out_p * 4 \
        + int(W1s.size) * 2 + int(W2s.size) * 2 + int(b1s.size) * 4 + int(b2s.size) * 4

    y = pl.pallas_call(
        functools.partial(_fused_mlp_kernel, act=activation),
        out_shape=jax.ShapeDtypeStruct((total_rows, out_p), jnp.float32),
        grid_spec=pltpu.PrefetchScalarGridSpec(
            num_scalar_prefetch=1,
            grid=(num_tiles,),
            in_specs=[
                # x row tile (lane dim = in_p == full array dim; no 128 padding of K)
                pl.BlockSpec((tm, in_p), lambda i, tid: (i, 0)),
                # weight/bias slabs picked via the scalar-prefetched per-tile type id; consecutive
                # tiles of the same type keep the slab VMEM-resident (no re-DMA).
                pl.BlockSpec((None, in_p, h_p), lambda i, tid: (tid[i], 0, 0)),
                pl.BlockSpec((None, 8, h_p), lambda i, tid: (tid[i], 0, 0)),
                pl.BlockSpec((None, h_p, out_p), lambda i, tid: (tid[i], 0, 0)),
                pl.BlockSpec((None, 8, out_p), lambda i, tid: (tid[i], 0, 0)),
            ],
            out_specs=pl.BlockSpec((tm, out_p), lambda i, tid: (i, 0)),
        ),
        compiler_params=pltpu.CompilerParams(
            # Single parallel axis = row tiles (all the work) -> balanced dual-TC sharding on v7x.
            dimension_semantics=("parallel",),
            # Explicit limit: v5e's scoped default is only 16 MiB; TM=2048 tiles fit easily in 32 MiB.
            vmem_limit_bytes=32 * 1024 * 1024,
        ),
        cost_estimate=pl.CostEstimate(flops=flops, transcendentals=transcendentals,
                                      bytes_accessed=bytes_accessed),
    )(tile_type_ids, x_grouped, W1s, b1s, W2s, b2s)

    # Split back into per-type segments; columns beyond max_out are padding only (the remaining
    # columns up to max_out already hold zeros for smaller action spaces == `_pad` semantics).
    return tuple(y[offsets[t]:offsets[t] + pad_ns[t], :max_out] for t in range(len(xs)))


def _choose_tm(ns, tm_max):
    # Next power of two of the largest per-type row count, clamped to [8, tm_max].
    m = max(max(ns), 1)
    return int(max(8, min(tm_max, pl.next_power_of_2(m))))


def qlayer_forward(x_dict, node_type, prepped_params, output_sizes, activation="relu",
                   tm=None, tm_max=2048):
    """Mirrors QLayer.forward: x_dict maps node-type -> (n_agents_of_type, input_size)."""
    max_out = max(output_sizes)
    node_type_np = np.asarray(node_type)
    present_types = tuple(sorted(set(int(v) for v in node_type_np.tolist())))

    xs, ns = [], []
    for nt in present_types:
        x = jnp.asarray(x_dict[nt], dtype=jnp.float32)
        if x.ndim == 1:                        # mirrors the ndim==1 unsqueeze in forward
            x = x[None, :]
        xs.append(x)
        ns.append(int(x.shape[0]))

    if tm is None:
        tm = _choose_tm(ns, tm_max)

    # Bucket each type's row count to a multiple of tm (zero rows are computed then dropped);
    # this keeps _forward_jit's traced shapes stable across small agent-count changes (no recompiles)
    # and gives the per-tile type-id table that drives the weight index_maps.
    xs_bucketed, tile_types = [], []
    for nt, x, n in zip(present_types, xs, ns):
        pad_n = _round_up(n, tm)
        if pad_n != n:
            x = jnp.pad(x, ((0, pad_n - n), (0, 0)))
        xs_bucketed.append(x)
        tile_types.extend([nt] * (pad_n // tm))
    tile_type_ids = jnp.asarray(np.asarray(tile_types, dtype=np.int32))

    W1s, b1s, W2s, b2s = prepped_params
    ys = _forward_jit(activation, max_out, tm, W1s, b1s, W2s, b2s, tile_type_ids, *xs_bucketed)

    output_dict = {}
    for i, nt in enumerate(present_types):
        node_indices = jnp.asarray(np.nonzero(node_type_np == nt)[0], dtype=jnp.int32)
        output_dict[nt] = (node_indices, ys[i][:ns[i]])   # drop the bucket-padding rows
    return output_dict


def init_params(key, input_size, hidden_size, output_sizes):
    """Xavier-uniform weights (gain = calculate_gain('sigmoid') = 1.0), PyTorch-default biases."""
    params = []
    for i, out_size in enumerate(output_sizes):
        k1, k2, k3, k4 = jax.random.split(jax.random.fold_in(key, i), 4)
        lim1 = float(np.sqrt(6.0 / (input_size + hidden_size)))
        lim2 = float(np.sqrt(6.0 / (hidden_size + out_size)))
        w1 = jax.random.uniform(k1, (input_size, hidden_size), jnp.float32, -lim1, lim1)
        w2 = jax.random.uniform(k2, (hidden_size, out_size), jnp.float32, -lim2, lim2)
        b1 = jax.random.uniform(k3, (hidden_size,), jnp.float32,
                                -1.0 / np.sqrt(input_size), 1.0 / np.sqrt(input_size))
        b2 = jax.random.uniform(k4, (out_size,), jnp.float32,
                                -1.0 / np.sqrt(hidden_size), 1.0 / np.sqrt(hidden_size))
        params.append((w1, b1, w2, b2))
    return params


if __name__ == "__main__":
    key = jax.random.PRNGKey(0)

    input_size = 32
    hidden_size = 32
    output_sizes = [6, 4]          # two node types with different action-space sizes
    node_type = np.array([0, 0, 1, 1, 0, 1], dtype=np.int32)   # 6 agents total

    params = init_params(key, input_size, hidden_size, output_sizes)
    prepped = prepare_params(params, input_size, hidden_size, output_sizes)  # one-time prep

    kx0, kx1 = jax.random.split(jax.random.fold_in(key, 100), 2)
    x_dict = {
        0: jax.random.normal(kx0, (int((node_type == 0).sum()), input_size), jnp.float32),
        1: jax.random.normal(kx1, (int((node_type == 1).sum()), input_size), jnp.float32),
    }

    out = qlayer_forward(x_dict, node_type, prepped, output_sizes, activation="relu")

    # reference check in plain JAX, matching the kernel's bf16-matmul / f32-accumulate precision
    ok = True
    for nt in sorted(out):
        w1, b1, w2, b2 = params[nt]
        xb = x_dict[nt].astype(jnp.bfloat16)
        h = jnp.dot(xb, w1.astype(jnp.bfloat16), preferred_element_type=jnp.float32) + b1
        h = jnp.maximum(h, 0.0)
        ref = jnp.dot(h.astype(jnp.bfloat16), w2.astype(jnp.bfloat16),
                      preferred_element_type=jnp.float32) + b2
        ref_pad = jnp.zeros((ref.shape[0], max(output_sizes))).at[:, :ref.shape[1]].set(ref)
        idx, y = out[nt]
        y = jax.block_until_ready(y)
        ok &= bool(jnp.allclose(y, ref_pad, atol=5e-3, rtol=5e-3))
        ok &= bool(np.array_equal(np.asarray(idx), np.nonzero(node_type == nt)[0]))

    if ok:
        print("KERNEL_OK")
    else:
        print("MISMATCH")
</pallas_src>

<mosaic_0001>
module attributes {stable_mosaic.version = 11 : i64} {
  func.func @_fused_mlp_kernel(%arg0: i32, %arg1: memref<2xi32, #tpu.memory_space<smem>>, %arg2: memref<8x32xbf16, #tpu.memory_space<vmem>>, %arg3: memref<1x32x128xbf16, #tpu.memory_space<vmem>>, %arg4: memref<1x8x128xf32, #tpu.memory_space<vmem>>, %arg5: memref<1x128x128xbf16, #tpu.memory_space<vmem>>, %arg6: memref<1x8x128xf32, #tpu.memory_space<vmem>>, %arg7: memref<8x128xf32, #tpu.memory_space<vmem>>) attributes {dimension_semantics = [#tpu.dimension_semantics<parallel>], iteration_bounds = array<i64: 2>, scalar_prefetch = 1 : i64, scratch_operands = 0 : i64, tpu.core_type = #tpu.core_type<tc>, window_params = [{transform_indices = @transform_0, window_bounds = array<i64: 8, 32>}, {transform_indices = @transform_1, window_bounds = array<i64: 1, 32, 128>}, {transform_indices = @transform_2, window_bounds = array<i64: 1, 8, 128>}, {transform_indices = @transform_3, window_bounds = array<i64: 1, 128, 128>}, {transform_indices = @transform_4, window_bounds = array<i64: 1, 8, 128>}, {transform_indices = @transform_5, window_bounds = array<i64: 8, 128>}]} {
    %c0 = arith.constant 0 : index
    %c0_0 = arith.constant 0 : index
    %0 = vector.load %arg2[%c0, %c0_0] : memref<8x32xbf16, #tpu.memory_space<vmem>>, vector<8x32xbf16>
    %c0_1 = arith.constant 0 : index
    %c0_2 = arith.constant 0 : index
    %c0_3 = arith.constant 0 : index
    %1 = vector.load %arg3[%c0_1, %c0_2, %c0_3] : memref<1x32x128xbf16, #tpu.memory_space<vmem>>, vector<1x32x128xbf16>
    %2 = vector.shape_cast %1 : vector<1x32x128xbf16> to vector<32x128xbf16>
    %cst = arith.constant dense<0.000000e+00> : vector<8x128xf32>
    %3 = tpu.matmul %0, %2, %cst {dimension_numbers = #tpu.dot_dimension_numbers<[1], [0], [0], [1], [0, 0, 1, 1], [], []>} : vector<8x32xbf16>, vector<32x128xbf16>, vector<8x128xf32> -> vector<8x128xf32>
    %c0_4 = arith.constant 0 : index
    %c0_5 = arith.constant 0 : index
    %c0_6 = arith.constant 0 : index
    %4 = vector.load %arg4[%c0_4, %c0_5, %c0_6] : memref<1x8x128xf32, #tpu.memory_space<vmem>>, vector<1x1x128xf32>
    %5 = vector.shape_cast %4 : vector<1x1x128xf32> to vector<1x128xf32>
    %6 = vector.broadcast %5 : vector<1x128xf32> to vector<8x128xf32>
    %7 = arith.addf %3, %6 : vector<8x128xf32>
    %cst_7 = arith.constant 0.000000e+00 : f32
    %8 = vector.broadcast %cst_7 : f32 to vector<8x128xf32>
    %9 = arith.maximumf %7, %8 : vector<8x128xf32>
    %10 = arith.truncf %9 : vector<8x128xf32> to vector<8x128xbf16>
    %c0_8 = arith.constant 0 : index
    %c0_9 = arith.constant 0 : index
    %c0_10 = arith.constant 0 : index
    %11 = vector.load %arg5[%c0_8, %c0_9, %c0_10] : memref<1x128x128xbf16, #tpu.memory_space<vmem>>, vector<1x128x128xbf16>
    %12 = vector.shape_cast %11 : vector<1x128x128xbf16> to vector<128x128xbf16>
    %cst_11 = arith.constant dense<0.000000e+00> : vector<8x128xf32>
    %13 = tpu.matmul %10, %12, %cst_11 {dimension_numbers = #tpu.dot_dimension_numbers<[1], [0], [0], [1], [0, 0, 1, 1], [], []>} : vector<8x128xbf16>, vector<128x128xbf16>, vector<8x128xf32> -> vector<8x128xf32>
    %c0_12 = arith.constant 0 : index
    %c0_13 = arith.constant 0 : index
    %c0_14 = arith.constant 0 : index
    %14 = vector.load %arg6[%c0_12, %c0_13, %c0_14] : memref<1x8x128xf32, #tpu.memory_space<vmem>>, vector<1x1x128xf32>
    %15 = vector.shape_cast %14 : vector<1x1x128xf32> to vector<1x128xf32>
    %16 = vector.broadcast %15 : vector<1x128xf32> to vector<8x128xf32>
    %17 = arith.addf %13, %16 : vector<8x128xf32>
    %c0_15 = arith.constant 0 : index
    %c0_16 = arith.constant 0 : index
    %18 = vector.load %arg7[%c0_15, %c0_16] : memref<8x128xf32, #tpu.memory_space<vmem>>, vector<8x128xf32>
    tpu.vector_store %arg7[%c0_15, %c0_16], %17 {strides = array<i32>} : memref<8x128xf32, #tpu.memory_space<vmem>>, vector<8x128xf32>,
    return
  }
  func.func @transform_0(%arg0: i32, %arg1: memref<2xi32, #tpu.memory_space<smem>>) -> (i32, i32) {
    %c0_i32 = arith.constant 0 : i32
    %c0_i32_0 = arith.constant 0 : i32
    return %arg0, %c0_i32 : i32, i32
  }
  func.func @transform_1(%arg0: i32, %arg1: memref<2xi32, #tpu.memory_space<smem>>) -> (i32, i32, i32) {
    %0 = arith.index_cast %arg0 : i32 to index
    %1 = memref.load %arg1[%0] : memref<2xi32, #tpu.memory_space<smem>>
    %c0_i32 = arith.constant 0 : i32
    %c0_i32_0 = arith.constant 0 : i32
    %c0_i32_1 = arith.constant 0 : i32
    return %1, %c0_i32, %c0_i32_0 : i32, i32, i32
  }
  func.func @transform_2(%arg0: i32, %arg1: memref<2xi32, #tpu.memory_space<smem>>) -> (i32, i32, i32) {
    %0 = arith.index_cast %arg0 : i32 to index
    %1 = memref.load %arg1[%0] : memref<2xi32, #tpu.memory_space<smem>>
    %c0_i32 = arith.constant 0 : i32
    %c0_i32_0 = arith.constant 0 : i32
    %c0_i32_1 = arith.constant 0 : i32
    return %1, %c0_i32, %c0_i32_0 : i32, i32, i32
  }
  func.func @transform_3(%arg0: i32, %arg1: memref<2xi32, #tpu.memory_space<smem>>) -> (i32, i32, i32) {
    %0 = arith.index_cast %arg0 : i32 to index
    %1 = memref.load %arg1[%0] : memref<2xi32, #tpu.memory_space<smem>>
    %c0_i32 = arith.constant 0 : i32
    %c0_i32_0 = arith.constant 0 : i32
    %c0_i32_1 = arith.constant 0 : i32
    return %1, %c0_i32, %c0_i32_0 : i32, i32, i32
  }
  func.func @transform_4(%arg0: i32, %arg1: memref<2xi32, #tpu.memory_space<smem>>) -> (i32, i32, i32) {
    %0 = arith.index_cast %arg0 : i32 to index
    %1 = memref.load %arg1[%0] : memref<2xi32, #tpu.memory_space<smem>>
    %c0_i32 = arith.constant 0 : i32
    %c0_i32_0 = arith.constant 0 : i32
    %c0_i32_1 = arith.constant 0 : i32
    return %1, %c0_i32, %c0_i32_0 : i32, i32, i32
  }
  func.func @transform_5(%arg0: i32, %arg1: memref<2xi32, #tpu.memory_space<smem>>) -> (i32, i32) {
    %c0_i32 = arith.constant 0 : i32
    %c0_i32_0 = arith.constant 0 : i32
    return %arg0, %c0_i32 : i32, i32
  }
}

</mosaic_0001>

<bundles_post_ra>
// kernel: _forward_jit.1
= control target key start
LH: loop header
LB: loop body
LE: loop exit
PB: predicated region body
PF: predicated region fallthrough
CT: control target
= control target key end

     0   :  { %s1019_s24 = smov [#allocation3]   ;;  %s1381_s0 = inlined_call_operand.vmem [shape: s32[2], index: 0, kind: input, shape index: {}]   ;;  %s1382_s1 = inlined_call_operand.vmem [shape: bf16[16,32], index: 1, kind: input, shape index: {}]   ;;  %s1383_s2 = inlined_call_operand.vmem [shape: bf16[2,32,128], index: 2, kind: input, shape index: {}]   ;;  %s1384_s3 = inlined_call_operand.hbm [shape: f32[2,8,128], index: 3, kind: input, shape index: {}]   ;;  %s1385_s4 = inlined_call_operand.hbm [shape: bf16[2,128,128], index: 4, kind: input, shape index: {}]   ;;  %s1386_s5 = inlined_call_operand.hbm [shape: f32[2,8,128], index: 5, kind: input, shape index: {}]   ;;  %s1387_s6 = inlined_call_operand.vmem [shape: f32[16,128], index: 6, kind: output, shape index: {}]  }
   0x1   :  { %1394 = sst [smem:[#allocation25_spill]] %s1385_s4  ;;  %s12_s23 = sshll.u32 %s1381_s0, 4  ;;  %s13_s23 = int_to_ptr.vmem [resolvable:$true] %s12_s23 }
   0x2   :  { %1395 = sst [smem:[#allocation26_spill]] %s1387_s6 }
   0x3   :  { %15 = dma.vmem_to_smem %s13_s23, 16, %s1019_s24, [#allocation2] }
   0x4   :  { %965 = dma.done.wait [#allocation2], 16 }
   0x5   :  { %966 = vsyncadd [#allocation2], 4294967280 }
   0x6   :  { %18 = sfence }
   0x7   :  { %19 = vsyncpa [#allocation5], 0 }
   0x8   :  { %21 = vsyncpa [#allocation5 + $0x1], 0 }
   0x9   :  { %22 = vsyncpa [#allocation7], 0 }
   0xa   :  { %24 = vsyncpa [#allocation7 + $0x1], 0  ;;  %s1060_s25 = smov 0   ;;  %s1062_s26 = smov 0  }
   0xb   :  { %s1064_s27 = smov 0   ;;  %s1066_s28 = smov 0  }
   0xc   :  { %s1068_s29 = smov 0   ;;  %s1070_s0 = smov 0  }
   0xd   :  { %s1072_s30 = smov 0   ;;  %s1074_s7 = smov 0  }
   0xe   :  { %s1076_s8 = smov 0   ;;  %s1078_s9 = smov 0  }
   0xf LB: > { %1396 = sst [smem:[#allocation19_spill]] %s1001_s0  ;;  %s1111_s10 = sadd.s32 1, %s1017_s9   ;;  %s1017_s9 = sphi %s1078_s9, %s1418_s9   ;;  %s1013_s8 = sphi %s1076_s8, %s1423_s8   ;;  %s1009_s7 = sphi %s1074_s7, %s1430_s7   ;;  %s1005_s30 = sphi %s1072_s30, %s1429_s30   ;;  %s1001_s0 = sphi %s1070_s0, %s1421_s0   ;;  %s997_s29 = sphi %s1068_s29, %s1428_s29   ;;  %s993_s28 = sphi %s1066_s28, %s1427_s28   ;;  %s989_s27 = sphi %s1064_s27, %s1426_s27   ;;  %s985_s26 = sphi %s1062_s26, %s1425_s26   ;;  %s981_s25 = sphi %s1060_s25, %s1424_s25  }
  0x10   : > { %1397 = sst [smem:[#allocation20_spill]] %s1013_s8  ;;  %p101_p0 = scmp.eq.s32.totalorder %s1017_s9, 0 }
  0x11   : > { %1398 = sst [smem:[#allocation21_spill]] %s1111_s10  ;;  %p128_p1 = scmp.ne.s32.totalorder %s1001_s0, %s997_s29 }
  0x12   : > { %s116_s11 = sld [smem:[#allocation3 + %s1017_s9]]  ;;  %s121_s13 = sadd.s32 1, %s1001_s0 }
  0x13   : > { %s117_s12 = sld [smem:[#allocation3 + %s1111_s10]]  ;;  %p1121_p2 = por %p128_p1, %p101_p0 }
  0x14   : > { %p134_p3 = scmp.ne.s32.totalorder %s997_s29, %s993_s28  ;;  %s249_s15 = sand.u32 1, %s1017_s9  }
  0x15   : > { %s251_s16 = sand.u32 1, %s1001_s0   ;;  %p1393_p4 = scmp.lt.s32.totalorder %s1017_s9, 2 }
  0x16   : > { %s641_s17 = sshll.u32 %s251_s16, 6  ;;  %p646_p7 = scmp.ge.s32.totalorder %s1017_s9, 1 }
  0x17   : > { %p1134_p5 = pnand %p1393_p4, %p1121_p2  ;;  %s253_s20 = scalar_lea.vmem [#allocation6], %s641_s17 }
  0x18   : > { %s1138_s21 = sshll.u32 %s253_s20, 4  ;;  %p290_p8 = scmp.lt.s32.totalorder %s1017_s9, 3 }
  0x19   : > { %s118_s18 = ssub.s32 %s116_s11, %s117_s12  ;;  %1401 = sst [smem:[#allocation22_spill]] %s1138_s21 }
  0x1a   : > { %p119_p6 = scmp.eq.s32.totalorder %s118_s18, 0  ;;  %p1155_p9 = pnand %p646_p7, %p290_p8 }
  0x1b   : > { %s712_s22 = scalar_select %p1121_p2, [#allocation3], [#allocation10] }
  0x1c   : > { %s1143_s23 = scalar_select %p119_p6, %s1001_s0, %s121_s13  }
  0x1d   : > { %s713_s24 = scalar_select %p1121_p2, %s1017_s9, 0 }
  0x1e   : > { %1402 = sst [smem:[#allocation23_spill]] %s1143_s23  ;;  %s1432_s22 = smov (!%p1393_p4, %s712_s22), [#allocation13] }
  0x1f   : > { %s1434_s24 = smov (!%p1393_p4, %s713_s24), 0  ;;  %s1160_s13 = sld [smem:[#allocation3 + %s1017_s9]] }
  0x20   : > { %s254_s11 = sld [smem:[%s1432_s22 + %s1434_s24]]  ;;  %s1167_s0 = sadd.s32 4294967295, %s1017_s9  }
  0x21   : > { %s1404_s4 = sld [smem:[#allocation25_spill]]  ;;  %p100_p10 = scmp.ne.s32.totalorder %s1013_s8, %s1009_s7 }
  0x22   : > { %s89_s20 = sld [smem:[#allocation3 + %s1111_s10]]  ;;  %s1171_s22 = scalar_lea.sflag [#allocation7], %s249_s15 }
  0x23   : > { %p839_p12 = pneg %p1134_p5 }
  0x26   : > { %s697_s16 = sshll.u32 %s254_s11, 6 }
  0x27   : > { %s259_s18 = scalar_lea.hbm %s1404_s4, %s697_s16  ;;  %s842_s16 = scalar_lea.hbm %s1404_s4, 128 }
  0x28   : > { %s260_s23 = sshll.u32 %s259_s18, 4  ;;  %s261_s23 = int_to_ptr.hbm [resolvable:$true] %s260_s23 }
  0x29   : > { %s835_s24 = sshra.s32 %s261_s23, 4  ;;  %s836_s24 = int_to_ptr.hbm [resolvable:$true] %s835_s24 }
  0x2a   : > { %s837_s21 = scalar_lea.hbm %s836_s24, 64  ;;  %p843_p2 = scmp.lt.s32.totalorder %s836_s24, %s1404_s4 }
  0x2b   : > { %p838_p11 = scmp.ne.s32.totalorder %s836_s24, %s837_s21  ;;  %p844_p6 = scmp.lt.s32.totalorder %s842_s16, %s837_s21 }
  0x2d   : > { %p840_p13 = pnand %p839_p12, %p838_p11  ;;  %p845_p7 = por %p844_p6, %p843_p2 }
  0x2f   : > { %p841_p1 = pneg %p840_p13 }
  0x31   : > { %p846_p8 = pnand %p845_p7, %p841_p1 }
  0x33   : > { %849 = shalt.err (!%p846_p8)
}
  0x34   : > { %s1020_s15 = smov 64   ;;  %s1405_s18 = sld [smem:[#allocation22_spill]] }
  0x35   : > { %s1021_s6 = smov 4   ;;  %s93_s24 = sadd.s32 1, %s1013_s8 }
  0x36   : > { %p106_p11 = scmp.ne.s32.totalorder %s1009_s7, %s1005_s30  ;;  %p107_p12 = scmp.eq.s32.totalorder %s1167_s0, 0 }
  0x37   : > { %s229_s11 = sand.u32 1, %s1013_s8   ;;  %s90_s16 = ssub.s32 %s1160_s13, %s89_s20 }
  0x38   : > { %p102_p13 = por %p101_p0, %p100_p10  ;;  %p91_p1 = scmp.eq.s32.totalorder %s90_s16, 0 }
  0x39   : > { %p1199_p2 = por %p107_p12, %p106_p11  ;;  %p162_p6 = scmp.ne.s32.totalorder %s985_s26, %s981_s25 }
  0x3a   : > { %s1406_s21 = int_to_ptr.vmem [resolvable:$true] %s1405_s18  ;;  %p1217_p10 = pnand %p1393_p4, %p102_p13 }
  0x3b   : > { %731 = dma.hbm_to_vmem [thread:$0]  (!%p1134_p5), %s261_s23, 1024, %s1406_s21, %s1171_s22, %s1020_s15, %s1020_s15, %s1021_s6  }
  0x3c   : > { %p1208_p5 = por %p134_p3, %p107_p12  ;;  %s639_s23 = sshll.u32 %s229_s11, 3 }
  0x3d   : > { %s1213_s13 = scalar_select %p91_p1, %s1013_s8, %s93_s24  }
  0x3e   : > { %s709_s14 = scalar_select %p102_p13, [#allocation3], [#allocation9] }
  0x3f   : > { %1409 = sst [smem:[#allocation24_spill]] %s1213_s13  ;;  %s233_s15 = scalar_lea.vmem [#allocation4], %s639_s23 }
  0x40   : > { %s710_s17 = scalar_select %p102_p13, %s1017_s9, 0 }
  0x41   : > { %s1436_s14 = smov (!%p1393_p4, %s709_s14), [#allocation12]  ;;  %s1226_s18 = sshll.u32 %s233_s15, 4  ;;  %s243_s18 = int_to_ptr.vmem [resolvable:$true] %s1226_s18 }
  0x42   : > { %s1438_s17 = smov (!%p1393_p4, %s710_s17), 0  ;;  %s144_s6 = sld [smem:[#allocation3 + %s1017_s9]] }
  0x43   : > { %s234_s28 = sld [smem:[%s1436_s14 + %s1438_s17]]  ;;  %p156_p3 = scmp.ne.s32.totalorder %s989_s27, %s985_s26 }
  0x44   : > { %s145_s21 = sld [smem:[#allocation3 + %s1111_s10]]  ;;  %p1246_p8 = por %p162_p6, %p107_p12 }
  0x45   : > { %p1240_p7 = por %p156_p3, %p101_p0  ;;  %s274_s17 = sand.u32 1, %s989_s27  }
  0x46   : > { %s230_s15 = scalar_lea.sflag [#allocation5], %s229_s11  ;;  %p869_p13 = pneg %p1217_p10 }
  0x49   : > { %s640_s24 = sshll.u32 %s234_s28, 3 }
  0x4a   : > { %s238_s13 = scalar_lea.hbm %s1384_s3, %s640_s24 }
  0x4b   : > { %s240_s23 = sshll.u32 %s238_s13, 4  ;;  %s872_s13 = scalar_lea.hbm %s1384_s3, 16  ;;  %s241_s23 = int_to_ptr.hbm [resolvable:$true] %s240_s23 }
  0x4c   : > { %s865_s28 = sshra.s32 %s241_s23, 4  ;;  %s866_s28 = int_to_ptr.hbm [resolvable:$true] %s865_s28 }
  0x4d   : > { %s867_s25 = scalar_lea.hbm %s866_s28, 8  ;;  %p873_p12 = scmp.lt.s32.totalorder %s866_s28, %s1384_s3 }
  0x4e   : > { %p868_p11 = scmp.ne.s32.totalorder %s866_s28, %s867_s25  ;;  %p874_p3 = scmp.lt.s32.totalorder %s872_s13, %s867_s25 }
  0x50   : > { %p870_p1 = pnand %p869_p13, %p868_p11  ;;  %p875_p6 = por %p874_p3, %p873_p12 }
  0x52   : > { %p871_p0 = pneg %p870_p1 }
  0x54   : > { %p876_p4 = pnand %p875_p6, %p871_p0 }
  0x56   : > { %879 = shalt.err (!%p876_p4)
}
  0x57   : > { %726 = dma.hbm_to_vmem [thread:$0]  (!%p1217_p10), %s241_s23, 128, %s243_s18, %s230_s15  }
  0x58   : > { %s146_s11 = ssub.s32 %s144_s6, %s145_s21  ;;  %s149_s4 = sadd.s32 1, %s989_s27 }
  0x59   : > { %p147_p11 = scmp.eq.s32.totalorder %s146_s11, 0  ;;  %s644_s10 = sshll.u32 %s274_s17, 3 }
  0x5a   : > { %s715_s28 = scalar_select %p1240_p7, [#allocation3], [#allocation11] }
  0x5b   : > { %s1265_s25 = scalar_select %p147_p11, %s989_s27, %s149_s4  }
  0x5c   : > { %s716_s20 = scalar_select %p1240_p7, %s1017_s9, 0 }
  0x5d   : > { %p1413_p4 = scmp.lt.s32.totalorder %s1017_s9, 2  ;;  %s276_s6 = scalar_lea.vmem [#allocation8], %s644_s10 }
  0x5e   : > { %s285_s21 = sshll.u32 %s276_s6, 4  ;;  %s902_s10 = scalar_lea.hbm %s1386_s5, 16  ;;  %s286_s21 = int_to_ptr.vmem [resolvable:$true] %s285_s21 }
  0x5f   : > { %s1440_s28 = smov (!%p1413_p4, %s715_s28), [#allocation14]  ;;  %p1414_p13 = pmov %p1413_p4 }
  0x60   : > { %p1415_p1 = pmov %p1413_p4 }
  0x61   : > { %s1442_s20 = smov (!%p1414_p13, %s716_s20), 0 }
  0x62   : > { %p1278_p0 = pnand %p1415_p1, %p1240_p7  ;;  %s277_s18 = sld [smem:[%s1440_s28 + %s1442_s20]] }
  0x64   : > { %p899_p7 = pneg %p1278_p0 }
  0x68   : > { %s645_s23 = sshll.u32 %s277_s18, 3 }
  0x69   : > { %s281_s13 = scalar_lea.hbm %s1386_s5, %s645_s23 }
  0x6a   : > { %s283_s16 = sshll.u32 %s281_s13, 4  ;;  %s284_s16 = int_to_ptr.hbm [resolvable:$true] %s283_s16 }
  0x6b   : > { %s895_s11 = sshra.s32 %s284_s16, 4  ;;  %s896_s11 = int_to_ptr.hbm [resolvable:$true] %s895_s11 }
  0x6c   : > { %s897_s8 = scalar_lea.hbm %s896_s11, 8  ;;  %p903_p6 = scmp.lt.s32.totalorder %s896_s11, %s1386_s5 }
  0x6d   : > { %p898_p10 = scmp.ne.s32.totalorder %s896_s11, %s897_s8  ;;  %p904_p11 = scmp.lt.s32.totalorder %s902_s10, %s897_s8 }
  0x6f   : > { %p900_p12 = pnand %p899_p7, %p898_p10  ;;  %p905_p4 = por %p904_p11, %p903_p6 }
  0x71   : > { %p901_p3 = pneg %p900_p12 }
  0x73   : > { %p906_p13 = pnand %p905_p4, %p901_p3 }
  0x75   : > { %909 = shalt.err (!%p906_p13)
}
  0x76   : > { %736 = dma.hbm_to_vmem [thread:$0]  (!%p1278_p0), %s284_s16, 128, %s286_s21, %s1171_s22  }
  0x77   : > { %294 = sbr.rel (%p1155_p9) target bundleno = 418 (0x1a2), region = 40  ;;  %s296_s18 = sand.u32 (!%p1155_p9), 1, %s1009_s7  }
  0x78   : > { %s1299_s6 = sshll.u32 (!%p1155_p9), %s296_s18, 3  ;;  %s297_s23 = scalar_lea.sflag (!%p1155_p9), [#allocation5], %s296_s18 }
  0x79   : > { %s300_s17 = scalar_lea.vmem (!%p1155_p9), [#allocation4], %s1299_s6 }
  0x7c   : > { %968 = dma.done.wait (%p1199_p2), %s297_s23, 128  }
  0x7d   : > { %970 = vsyncadd (%p1199_p2), %s297_s23, 4294967168  ;;  %s306_s22 = sand.u32 1, %s1167_s0   ;;  %s308_s24 = sand.u32 1, %s997_s29  }
  0x7e   : > { %s648_s12 = sshll.u32 %s308_s24, 6  ;;  %s307_s21 = scalar_lea.sflag [#allocation7], %s306_s22 }
  0x7f   : > { %s1308_s15 = scalar_lea.vmem [#allocation6], %s648_s12 }
  0x80   : > { %972 = dma.done.wait (%p1208_p5), %s307_s21, 1024  }
  0x81   : > { %974 = vsyncadd (%p1208_p5), %s307_s21, 4294966272  ;;  %s318_s13 = sand.u32 1, %s985_s26  }
  0x82   : > { %s1315_s16 = sshll.u32 %s318_s13, 3 }
  0x83   : > { %s320_s19 = scalar_lea.vmem [#allocation8], %s1315_s16 }
  0x84   : > { %976 = dma.done.wait (%p1246_p8), %s307_s21, 128  }
  0x85   : > { %978 = vsyncadd (%p1246_p8), %s307_s21, 4294967168  ;;  %s371_s30 = sld [smem:[#allocation3 + %s1167_s0]]  ;;  %p367_p9 = scmp.lt.s32.totalorder %s1167_s0, 1  ;;  %v708_v0 = vld [vmem:[%s1308_s15 + $0x38] sm:$0xff]  ;;  %v707_v1 = vld [vmem:[%s1308_s15 + $0x30] sm:$0xff]  ;;  %vm405_vm0 = vcmask 261120  }
  0x86   : > { %490 = vmatpush.bf16.msra.mxu1 %v708_v0  ;;  %v706_v3 = vld [vmem:[%s1308_s15 + $0x28] sm:$0xff]  ;;  %v705_v5 = vld [vmem:[%s1308_s15 + $0x20] sm:$0xff]  ;;  %v704_v7 = vld [vmem:[%s1308_s15 + $0x18] sm:$0xff]  ;;  %s1417_s24 = sld [smem:[#allocation26_spill]] }
  0x87   : > { %s1444_s0 = smov (!%p367_p9, %s1167_s0), 1  ;;  %v703_v8 = vld [vmem:[%s1308_s15 + $0x10] sm:$0xff]  ;;  %v702_v9 = vld [vmem:[%s1308_s15 + $0x8] sm:$0xff]  ;;  %v701_v10 = vld [vmem:[%s1308_s15] sm:$0xff] }
  0x88   : > { %s650_s4 = sshll.u32 %s1444_s0, 2  ;;  %v821_v11 = vld [vmem:[%s300_s17] ss:$0 sm:$0xff]  ;;  %s653_s18 = sshll.u32 %s1444_s0, 3  ;;  %v822_v17 = vld [vmem:[%s320_s19] ss:$0 sm:$0xff] }
  0x89   : > { %s370_s20 = scalar_lea.vmem %s1382_s1, %s650_s4 }
  0x8a   : > { %491 = vmatpush.bf16.msra.mxu1 %v707_v1  ;;  %v386_v6 = vld [vmem:[%s370_s20] sm:$0xf] }
  0x8b   : > { %p372_p2 = scmp.lt.s32.totalorder %s371_s30, 1 }
  0x8c   : > { %s384_s12 = scalar_lea.vmem %s1417_s24, %s653_s18 }
  0x8d   : > { %s1446_s30 = smov (!%p372_p2, %s371_s30), 1 }
  0x8e   : > { %s698_s14 = sshll.u32 %s1446_s30, 4  ;;  %492 = vmatpush.bf16.msra.mxu1 %v706_v3 }
  0x8f   : > { %s376_s9 = scalar_lea.vmem %s1383_s2, %s698_s14 }
  0x90   : > { %v700_v2 = vld [vmem:[%s376_s9 + $0x8] sm:$0xff]  ;;  %v699_v4 = vld [vmem:[%s376_s9] sm:$0xff] }
  0x91   : > { %415 = vmatpush.bf16.msra.mxu0 %v700_v2 }
  0x92   : > { %493 = vmatpush.bf16.msra.mxu1 %v705_v5 }
  0x95   : > { %416 = vmatpush.bf16.msra.mxu0 %v699_v4 }
  0x96   : > { %494 = vmatpush.bf16.msra.mxu1 %v704_v7 }
  0x98   : > { %662 = vmatmul.msk.bf16.vlgmr.msra.gmra.mxu0 %vm405_vm0, %v386_v6 }
  0x9a   : > { %495 = vmatpush.bf16.msra.mxu1 %v703_v8 }
  0x9e   : > { %496 = vmatpush.bf16.msra.mxu1 %v702_v9 }
  0xa2   : > { %497 = vmatpush.bf16.msra.mxu1 %v701_v10 }
 0x115   : > { %v418_v12 = vpop.f32.mrf.mxu0 }
 0x116   : > { %v419_v13 = vadd.f32 %v821_v11, %v418_v12 }
 0x118   : > { %v422_v14 = vmax.f32 %v419_v13, 0.0 }
 0x11a   : > { %v423_v15 = vpack.c.bf16 %v422_v14, %v422_v14 }
 0x11c   : > { %498 = vmatmul.bf16.vlgmr.msra.gmra.mxu1 %v423_v15 }
 0x11d   : > { %v420_v16 = vpop.f32.mrf.mxu0 }
 0x199   : > { %v499_v18 = vpop.f32.mrf.mxu1 }
 0x19a   : > { %v500_v19 = vadd.f32 %v822_v17, %v499_v18 }
 0x19c   : > { %503 = vst [vmem:[%s384_s12] sm:$0xff] %v500_v19 }
 0x1a1   : > { %v501_v20 = vpop.f32.mrf.mxu1 }
 0x1a2 PF: > { %s1418_s9 = sld [smem:[#allocation21_spill]]  ;;  %s1419_s6 = smov %s1265_s25 }
 0x1a3   : > { %s1420_s17 = sld [smem:[#allocation19_spill]]  ;;  %s1424_s25 = smov %s985_s26 }
 0x1a4   : > { %s1421_s0 = sld [smem:[#allocation23_spill]]  ;;  %s1425_s26 = smov %s989_s27 }
 0x1a5   : > { %s1422_s21 = sld [smem:[#allocation20_spill]]  ;;  %s1426_s27 = smov %s1419_s6 }
 0x1a6   : > { %s1423_s8 = sld [smem:[#allocation24_spill]]  ;;  %s1427_s28 = smov %s997_s29 }
 0x1a7   : > { %s1429_s30 = smov %s1009_s7 }
 0x1a8   : > { %p27_p5 = scmp.ge.s32.totalorder %s1418_s9, 4  }
 0x1a9   : > { %s1428_s29 = smov %s1420_s17 }
 0x1aa   :  { %29 = sbr.rel (!%p27_p5) target bundleno = 15 (0xf), region = 110 }
 0x1ab   : > { %s1430_s7 = smov %s1422_s21 }
 0x1af   :  { %523 = vsyncpa [#allocation5], 1 }
 0x1b0   :  { %525 = vsyncpa [#allocation5 + $0x1], 1 }
 0x1b1   :  { %526 = vsyncpa [#allocation7], 1 }
 0x1b2   :  { %528 = vsyncpa [#allocation7 + $0x1], 1 }

</bundles_post_ra>
